<compile_context>
chip_gen: v6e
topology: v6e:2x2x1
jax: 0.10.0
libtpu: 0.0.40
codegen_flags: <defaults>
</compile_context>

<pallas_src>
import math

import jax
import jax.numpy as jnp
from jax.experimental import pallas as pl
from jax.experimental.pallas import tpu as pltpu


# ---------------------------------------------------------------------------
# Hardware detection (best effort; conservative defaults, never needed for
# correctness).
# ---------------------------------------------------------------------------
def _first_positive_int(obj, names):
    for name in names:
        v = getattr(obj, name, None)
        if v is None:
            continue
        try:
            v = int(v)
        except Exception:
            continue
        if v > 0:
            return v
    return None


def _detect_hw():
    vmem_bytes = 64 * 1024 * 1024        # conservative: v7x per-TC VMEM
    num_cores = 1
    try:
        info = pltpu.get_tpu_info()
        v = _first_positive_int(
            info, ("vmem_capacity_bytes", "vmem_bytes", "vmem_size_bytes"))
        if v is not None:
            vmem_bytes = v
        c = _first_positive_int(
            info, ("num_cores", "tensorcores_per_chip", "num_tensorcores",
                   "cores_per_chip"))
        if c is not None:
            num_cores = min(c, 2)
    except Exception:
        pass
    try:
        kind = jax.devices()[0].device_kind.lower()
        if "7" in kind:                   # v7x: 2 TensorCores, 64 MiB VMEM/TC
            num_cores = max(num_cores, 2)
            vmem_bytes = min(vmem_bytes, 64 * 1024 * 1024)
    except Exception:
        pass
    return vmem_bytes, num_cores


# ---------------------------------------------------------------------------
# Kernel
# ---------------------------------------------------------------------------
def _make_reg_loss_kernel(group: int, use_sel: bool):
    """One (TB, group*K) tile; accumulates per-group partial sums in lanes."""

    def body(pred_ref, gt_ref, mask_ref, sel_ref, out_ref):
        t = pl.program_id(1)

        @pl.when(t == 0)
        def _init():
            out_ref[...] = jnp.zeros_like(out_ref)

        # Widen in-register (inputs stay narrow in HBM).
        p = pred_ref[...].astype(jnp.float32)            # (TB, width)
        g = gt_ref[...].astype(jnp.float32)              # (TB, width)
        m = mask_ref[...]                                 # (TB, group) f32 {0,1}

        # sigmoid(x) = 0.5*tanh(0.5*x) + 0.5 -> a single EUP transcendental.
        diff = jnp.abs(0.5 * jnp.tanh(0.5 * p) + 0.5 - g)

        if use_sel:
            # `group` original batch rows are folded into each kernel row;
            # recover per-original-row sums with the resident 0/1 selection
            # matrix on the otherwise-idle MXU.
            row = jnp.dot(diff, sel_ref[...],
                          preferred_element_type=jnp.float32)   # (TB, group)
        else:
            row = jnp.sum(diff, axis=1, keepdims=True)          # (TB, 1)

        # Select (not multiply): rows with mask==0 (invalid, padding, or the
        # unspecified tails of clamped edge blocks) contribute exactly 0.
        masked = jnp.where(m > 0.5, row, 0.0)
        col = jnp.sum(masked, axis=0, keepdims=True)            # (1, group)

        cur = out_ref[0, :, pl.ds(0, group)]
        out_ref[0, :, pl.ds(0, group)] = cur + col

    if use_sel:
        return body

    def body_no_sel(pred_ref, gt_ref, mask_ref, out_ref):
        return body(pred_ref, gt_ref, mask_ref, None, out_ref)

    return body_no_sel


# ---------------------------------------------------------------------------
# Wrapper (RegLoss.forward)
# ---------------------------------------------------------------------------
def reg_loss(pred, gt_means, valid=None, *, min_pallas_elems=256 * 1024):
    """Pallas implementation of RegLoss.forward (L1Loss(reduction='mean'))."""
    pred = jnp.asarray(pred)
    gt_means = jnp.asarray(gt_means)

    b = pred.shape[0]
    pred2 = pred.reshape(b, -1)
    gt2 = gt_means.reshape(b, -1)
    k = pred2.shape[1]

    if valid is None:
        mask1d = jnp.ones((b,), jnp.float32)
    else:
        mask1d = jnp.asarray(valid).reshape(b).astype(jnp.float32)

    count = jnp.sum(mask1d) * jnp.float32(k)
    n_elems = b * k

    # ---- tiny-input fast path: XLA fusion beats kernel launch overhead -----
    if n_elems < min_pallas_elems:
        diff = jnp.abs(jax.nn.sigmoid(pred2.astype(jnp.float32))
                       - gt2.astype(jnp.float32))
        total = jnp.sum(diff * mask1d[:, None])
        return jnp.where(count > 0.0, total / jnp.maximum(count, 1.0),
                         jnp.float32(0.0))

    vmem_bytes, num_cores = _detect_hw()
    core_par = getattr(pltpu, "CORE_PARALLEL", None)
    arb = getattr(pltpu, "ARBITRARY", "arbitrary")

    # ---- lane-dense fold: pack `group` batch rows into one kernel row ------
    group = 1
    if k % 128 != 0:
        cand = 128 // math.gcd(k, 128)        # power of 2, <= 128
        if b % cand == 0:
            group = cand
    rows = b // group
    width = group * k
    use_sel = group > 1

    pred2 = pred2.reshape(rows, width)
    gt2 = gt2.reshape(rows, width)
    mask2 = mask1d.reshape(rows, group)

    p_item = jnp.dtype(pred2.dtype).itemsize
    g_item = jnp.dtype(gt2.dtype).itemsize

    # ---- row-tile size: ~2M elements per input tile, capped by a
    #      generation-aware VMEM budget for the double-buffered streams ------
    stream_budget = min(40 * 1024 * 1024, int(vmem_bytes * 0.6))
    bytes_per_row = 2 * width * (p_item + g_item)       # pred+gt, 2 bufs each
    max_tb_vmem = max(8, stream_budget // max(bytes_per_row, 1))
    target_rows = max(8, (2 * 1024 * 1024) // max(width, 1))

    if rows <= 8:
        tb = rows                                        # block == full dim
    else:
        tb = min(rows, max_tb_vmem, target_rows)
        tb = max(8, (tb // 8) * 8)
    nblocks = pl.cdiv(rows, tb)

    # ---- leading core axis: only shard when the chip really has 2 TCs ------
    nc = 2 if (num_cores >= 2 and core_par is not None and nblocks >= 2) else 1
    t_steps = pl.cdiv(nblocks, nc)
    rows_total = nc * t_steps * tb
    if rows_total > rows:
        # Only the tiny mask is padded in HBM; pred/gt edge blocks are simply
        # clamped and their unspecified tails are killed by mask==0.
        mask2 = jnp.pad(mask2, ((0, rows_total - rows), (0, 0)))

    if nc == 2:
        dims = (core_par, arb)
    else:
        dims = ("arbitrary", "arbitrary")

    # ---- VMEM limit derived from the actual footprint ----------------------
    footprint = (2 * tb * width * (p_item + g_item)      # pred+gt, 2 buffers
                 + 2 * tb * group * 4                    # mask, 2 buffers
                 + (2 * width * group * 4 if use_sel else 0)
                 + 2 * 128 * 4)
    vmem_limit = int(min(max(footprint + 8 * 1024 * 1024, 16 * 1024 * 1024),
                         vmem_bytes))

    def data_index(c, t):
        # Clamp phantom tiles (uneven split across cores) to a valid block;
        # their mask block is all zeros so they contribute nothing.
        return (jnp.minimum(c * t_steps + t, nblocks - 1), 0)

    def mask_index(c, t):
        return (c * t_steps + t, 0)

    in_specs = [
        pl.BlockSpec((tb, width), data_index),
        pl.BlockSpec((tb, width), data_index),
        pl.BlockSpec((tb, group), mask_index),
    ]
    inputs = [pred2, gt2, mask2]
    if use_sel:
        # Selection matrix sel[l, j] = 1 iff lane l belongs to folded sub-row
        # j.  Constant index_map -> DMA'd once, stays resident in VMEM.
        sel = (jnp.arange(width, dtype=jnp.int32)[:, None] // k
               == jnp.arange(group, dtype=jnp.int32)[None, :]
               ).astype(jnp.float32)
        in_specs.append(pl.BlockSpec((width, group), lambda c, t: (0, 0)))
        inputs.append(sel)

    cost = pl.CostEstimate(
        flops=8 * n_elems + 2 * n_elems * (group if use_sel else 1),
        transcendentals=n_elems,
        bytes_accessed=(n_elems * (p_item + g_item)
                        + rows_total * group * 4
                        + (width * group * 4 if use_sel else 0)
                        + nc * 128 * 4),
    )

    kernel = _make_reg_loss_kernel(group, use_sel)

    partials = pl.pallas_call(
        kernel,
        out_shape=jax.ShapeDtypeStruct((nc, 1, 128), jnp.float32),
        grid=(nc, t_steps),
        in_specs=in_specs,
        out_specs=pl.BlockSpec((1, 1, 128), lambda c, t: (c, 0, 0)),
        compiler_params=pltpu.CompilerParams(
            dimension_semantics=dims,
            vmem_limit_bytes=vmem_limit,
        ),
        cost_estimate=cost,
    )(*inputs)

    total = jnp.sum(partials)            # lanes >= group stay zero
    # PyTorch: if `valid` is given and no row is valid, return 0.0
    return jnp.where(count > 0.0, total / jnp.maximum(count, 1.0),
                     jnp.float32(0.0))


# ---------------------------------------------------------------------------
# Pure-JAX reference (mirrors the PyTorch module)
# ---------------------------------------------------------------------------
def _reference(pred, gt_means, valid=None):
    pred = jnp.asarray(pred).astype(jnp.float32)
    gt = jnp.asarray(gt_means).astype(jnp.float32)
    b = pred.shape[0]
    p2 = pred.reshape(b, -1)
    g2 = gt.reshape(b, -1)
    if valid is None:
        m = jnp.ones((b,), jnp.float32)
    else:
        m = jnp.asarray(valid).astype(jnp.float32).reshape(b)
    diff = jnp.abs(jax.nn.sigmoid(p2) - g2) * m[:, None]
    cnt = jnp.sum(m) * p2.shape[1]
    return jnp.where(cnt > 0, jnp.sum(diff) / jnp.maximum(cnt, 1.0), 0.0)


if __name__ == "__main__":
    key = jax.random.PRNGKey(0)
    keys = jax.random.split(key, 10)

    def check(out, ref, tol):
        out = float(jax.block_until_ready(out))
        ref = float(ref)
        assert abs(out - ref) < tol, (out, ref)

    # ---- primary small case (module's typical usage): fast path + kernel ---
    B, K = 8, 32
    pred = jax.random.normal(keys[0], (B, K), dtype=jnp.float32)
    gt = jax.random.uniform(keys[1], (B, K), dtype=jnp.float32)
    valid = jax.random.bernoulli(keys[2], p=0.6, shape=(B,))

    check(reg_loss(pred, gt), _reference(pred, gt), 1e-5)
    check(reg_loss(pred, gt, valid), _reference(pred, gt, valid), 1e-5)
    # force the Pallas kernel path on the same small inputs
    check(reg_loss(pred, gt, valid, min_pallas_elems=0),
          _reference(pred, gt, valid), 1e-5)
    # all rows invalid -> 0.0 (matches the module's early return)
    none_valid = jnp.zeros((B,), dtype=bool)
    check(reg_loss(pred, gt, none_valid, min_pallas_elems=0), 0.0, 1e-7)

    # ---- medium: lane-dense fold (group=8), multi-block grid, edge block ---
    B2, K2 = 1000, 16
    pred_m = jax.random.normal(keys[3], (B2, K2), dtype=jnp.float32)
    gt_m = jax.random.uniform(keys[4], (B2, K2), dtype=jnp.float32)
    valid_m = jax.random.bernoulli(keys[5], p=0.7, shape=(B2,))
    check(reg_loss(pred_m, gt_m, valid_m, min_pallas_elems=0),
          _reference(pred_m, gt_m, valid_m), 1e-4)

    # bf16 pred stays narrow in HBM and is widened in-kernel
    check(reg_loss(pred_m.astype(jnp.bfloat16), gt_m, valid_m,
                   min_pallas_elems=0),
          _reference(pred_m.astype(jnp.bfloat16), gt_m, valid_m), 1e-4)

    # ---- awkward K=17: relaxed fold cap -> group=128, lane-dense width -----
    B3, K3 = 128, 17
    pred_a = jax.random.normal(keys[6], (B3, K3), dtype=jnp.float32)
    gt_a = jax.random.uniform(keys[7], (B3, K3), dtype=jnp.float32)
    valid_a = jax.random.bernoulli(keys[8], p=0.5, shape=(B3,))
    check(reg_loss(pred_a, gt_a, valid_a, min_pallas_elems=0),
          _reference(pred_a, gt_a, valid_a), 1e-4)

    # ---- large enough to take the kernel path by default (group=1) ---------
    B4, K4 = 1024, 384
    pred_l = jax.random.normal(keys[9], (B4, K4), dtype=jnp.float32)
    gt_l = jax.random.uniform(keys[0], (B4, K4), dtype=jnp.float32)
    check(reg_loss(pred_l, gt_l), _reference(pred_l, gt_l), 5e-4)

    print("KERNEL_OK")
</pallas_src>

<mosaic_0001>
module attributes {stable_mosaic.version = 11 : i64} {
  func.func @body(%arg0: i32, %arg1: i32, %arg2: memref<2x128xf32, #tpu.memory_space<vmem>>, %arg3: memref<2x128xf32, #tpu.memory_space<vmem>>, %arg4: memref<2x4xf32, #tpu.memory_space<vmem>>, %arg5: memref<128x4xf32, #tpu.memory_space<vmem>>, %arg6: memref<1x1x128xf32, #tpu.memory_space<vmem>>) attributes {dimension_semantics = [#tpu.dimension_semantics<arbitrary>, #tpu.dimension_semantics<arbitrary>], iteration_bounds = array<i64: 1, 1>, scalar_prefetch = 0 : i64, scratch_operands = 0 : i64, tpu.core_type = #tpu.core_type<tc>, window_params = [{transform_indices = @transform_0, window_bounds = array<i64: 2, 128>}, {transform_indices = @transform_1, window_bounds = array<i64: 2, 128>}, {transform_indices = @transform_2, window_bounds = array<i64: 2, 4>}, {pipeline_mode = #tpu.pipeline_mode<synchronous>, transform_indices = @transform_3, window_bounds = array<i64: 128, 4>}, {transform_indices = @transform_4, window_bounds = array<i64: 1, 1, 128>}]} {
    %c0_i32 = arith.constant 0 : i32
    %0 = arith.cmpi eq, %arg1, %c0_i32 : i32
    %1 = arith.extui %0 : i1 to i32
    %c0_i32_0 = arith.constant 0 : i32
    %2 = arith.cmpi ne, %1, %c0_i32_0 : i32
    scf.if %2 {
      %cst_20 = arith.constant 0.000000e+00 : f32
      %29 = vector.broadcast %cst_20 : f32 to vector<1x1x128xf32>
      %c0_21 = arith.constant 0 : index
      %c0_22 = arith.constant 0 : index
      %c0_23 = arith.constant 0 : index
      %30 = vector.load %arg6[%c0_21, %c0_22, %c0_23] : memref<1x1x128xf32, #tpu.memory_space<vmem>>, vector<1x1x128xf32>
      tpu.vector_store %arg6[%c0_21, %c0_22, %c0_23], %29 {strides = array<i32>} : memref<1x1x128xf32, #tpu.memory_space<vmem>>, vector<1x1x128xf32>,
    } else {
    }
    %c0 = arith.constant 0 : index
    %c0_1 = arith.constant 0 : index
    %3 = vector.load %arg2[%c0, %c0_1] : memref<2x128xf32, #tpu.memory_space<vmem>>, vector<2x128xf32>
    %c0_2 = arith.constant 0 : index
    %c0_3 = arith.constant 0 : index
    %4 = vector.load %arg3[%c0_2, %c0_3] : memref<2x128xf32, #tpu.memory_space<vmem>>, vector<2x128xf32>
    %c0_4 = arith.constant 0 : index
    %c0_5 = arith.constant 0 : index
    %5 = vector.load %arg4[%c0_4, %c0_5] : memref<2x4xf32, #tpu.memory_space<vmem>>, vector<2x4xf32>
    %cst = arith.constant 5.000000e-01 : f32
    %6 = vector.broadcast %cst : f32 to vector<2x128xf32>
    %7 = arith.mulf %6, %3 : vector<2x128xf32>
    %8 = math.tanh %7 : vector<2x128xf32>
    %cst_6 = arith.constant 5.000000e-01 : f32
    %9 = vector.broadcast %cst_6 : f32 to vector<2x128xf32>
    %10 = arith.mulf %9, %8 : vector<2x128xf32>
    %cst_7 = arith.constant 5.000000e-01 : f32
    %11 = vector.broadcast %cst_7 : f32 to vector<2x128xf32>
    %12 = arith.addf %10, %11 : vector<2x128xf32>
    %13 = arith.subf %12, %4 : vector<2x128xf32>
    %14 = math.absf %13 : vector<2x128xf32>
    %c0_8 = arith.constant 0 : index
    %c0_9 = arith.constant 0 : index
    %15 = vector.load %arg5[%c0_8, %c0_9] : memref<128x4xf32, #tpu.memory_space<vmem>>, vector<128x4xf32>
    %cst_10 = arith.constant dense<0.000000e+00> : vector<2x4xf32>
    %16 = tpu.matmul %14, %15, %cst_10 {dimension_numbers = #tpu.dot_dimension_numbers<[1], [0], [0], [1], [0, 0, 1, 1], [], []>} : vector<2x128xf32>, vector<128x4xf32>, vector<2x4xf32> -> vector<2x4xf32>
    %cst_11 = arith.constant 5.000000e-01 : f32
    %17 = vector.broadcast %cst_11 : f32 to vector<2x4xf32>
    %18 = arith.cmpf ogt, %5, %17 : vector<2x4xf32>
    %cst_12 = arith.constant 0.000000e+00 : f32
    %19 = vector.broadcast %cst_12 : f32 to vector<2x4xf32>
    %20 = arith.select %18, %16, %19 : vector<2x4xi1>, vector<2x4xf32>
    %cst_13 = arith.constant dense<0.000000e+00> : vector<4xf32>
    %21 = vector.multi_reduction <add>, %20, %cst_13 [0] : vector<2x4xf32> to vector<4xf32>
    %22 = vector.shape_cast %21 : vector<4xf32> to vector<1x4xf32>
    %c0_14 = arith.constant 0 : index
    %c0_15 = arith.constant 0 : index
    %c0_16 = arith.constant 0 : index
    %23 = vector.load %arg6[%c0_14, %c0_15, %c0_16] : memref<1x1x128xf32, #tpu.memory_space<vmem>>, vector<1x1x4xf32>
    %24 = vector.shape_cast %23 : vector<1x1x4xf32> to vector<1x4xf32>
    %25 = arith.addf %24, %22 : vector<1x4xf32>
    %c0_17 = arith.constant 0 : index
    %c0_18 = arith.constant 0 : index
    %c0_19 = arith.constant 0 : index
    %26 = vector.load %arg6[%c0_17, %c0_18, %c0_19] : memref<1x1x128xf32, #tpu.memory_space<vmem>>, vector<1x1x4xf32>
    %27 = vector.shape_cast %26 : vector<1x1x4xf32> to vector<1x4xf32>
    %28 = vector.shape_cast %25 : vector<1x4xf32> to vector<1x1x4xf32>
    tpu.vector_store %arg6[%c0_17, %c0_18, %c0_19], %28 {strides = array<i32>} : memref<1x1x128xf32, #tpu.memory_space<vmem>>, vector<1x1x4xf32>,
    return
  }
  func.func @transform_0(%arg0: i32, %arg1: i32) -> (i32, i32) {
    %c1_i32 = arith.constant 1 : i32
    %0 = arith.muli %arg0, %c1_i32 : i32
    %1 = arith.addi %0, %arg1 : i32
    %c0_i32 = arith.constant 0 : i32
    %2 = arith.minsi %1, %c0_i32 : i32
    %c0_i32_0 = arith.constant 0 : i32
    %c0_i32_1 = arith.constant 0 : i32
    return %2, %c0_i32_0 : i32, i32
  }
  func.func @transform_1(%arg0: i32, %arg1: i32) -> (i32, i32) {
    %c1_i32 = arith.constant 1 : i32
    %0 = arith.muli %arg0, %c1_i32 : i32
    %1 = arith.addi %0, %arg1 : i32
    %c0_i32 = arith.constant 0 : i32
    %2 = arith.minsi %1, %c0_i32 : i32
    %c0_i32_0 = arith.constant 0 : i32
    %c0_i32_1 = arith.constant 0 : i32
    return %2, %c0_i32_0 : i32, i32
  }
  func.func @transform_2(%arg0: i32, %arg1: i32) -> (i32, i32) {
    %c1_i32 = arith.constant 1 : i32
    %0 = arith.muli %arg0, %c1_i32 : i32
    %1 = arith.addi %0, %arg1 : i32
    %c0_i32 = arith.constant 0 : i32
    %c0_i32_0 = arith.constant 0 : i32
    return %1, %c0_i32 : i32, i32
  }
  func.func @transform_3(%arg0: i32, %arg1: i32) -> (i32, i32) {
    %c0_i32 = arith.constant 0 : i32
    %c0_i32_0 = arith.constant 0 : i32
    %c0_i32_1 = arith.constant 0 : i32
    return %c0_i32, %c0_i32_0 : i32, i32
  }
  func.func @transform_4(%arg0: i32, %arg1: i32) -> (i32, i32, i32) {
    %c0_i32 = arith.constant 0 : i32
    %c0_i32_0 = arith.constant 0 : i32
    %c0_i32_1 = arith.constant 0 : i32
    return %arg0, %c0_i32, %c0_i32_0 : i32, i32, i32
  }
}

</mosaic_0001>

<bundles_post_ra>
// kernel: tpu_custom_call.1
= control target key start
LH: loop header
LB: loop body
LE: loop exit
PB: predicated region body
PF: predicated region fallthrough
CT: control target
= control target key end

     0   :  { %v314_v1 = vmov 0.0   ;;  %vm315_vm0 = vmmov 0   ;;  %s402_s0 = inlined_call_operand.vmem [shape: f32[2,128], index: 0, kind: input, shape index: {}]   ;;  %s403_s1 = inlined_call_operand.vmem [shape: f32[2,128], index: 1, kind: input, shape index: {}]   ;;  %s404_s2 = inlined_call_operand.vmem [shape: f32[2,4], index: 2, kind: input, shape index: {}]   ;;  %s405_s3 = inlined_call_operand.vmem [shape: f32[128,4], index: 3, kind: input, shape index: {}]   ;;  %s406_s4 = inlined_call_operand.hbm [shape: f32[1,1,128], index: 4, kind: output, shape index: {}]  }
   0x1   :  { %v118_v0 = vld [vmem:[%s405_s3 + $0x78] sm:$0xff]  ;;  %252 = vmatprep.subr.mxu0 %v314_v1  ;;  %93 = vst [vmem:[#allocation2] sm:$0x1] %v314_v1  ;;  %v117_v2 = vld [vmem:[%s405_s3 + $0x70] sm:$0xff]  ;;  %284 = vmatprep.mubr.msk.f32.mxu0 %vm315_vm0, %v314_v1  ;;  %v116_v3 = vld [vmem:[%s405_s3 + $0x68] sm:$0xff] }
   0x2   :  { %253 = vmatpush3.msra.mxu0 %v118_v0  ;;  %v115_v4 = vld [vmem:[%s405_s3 + $0x60] sm:$0xff] }
   0x3   :  { %254 = vmatprep.subr.mxu0 %v314_v1  ;;  %v94_v5 = vld [vmem:[%s402_s0] sm:$0x3] }
   0x4   :  { %255 = vmatpush3.msra.mxu0 %v117_v2  ;;  %v97_v6 = vmul.f32 0.5, %v94_v5 }
   0x5   :  { %256 = vmatprep.subr.mxu0 %v314_v1 }
   0x6   :  { %257 = vmatpush3.msra.mxu0 %v116_v3 }
   0x7   :  { %9 = vsyncpa [#allocation3], 0  ;;  %258 = vmatprep.subr.mxu0 %v314_v1  ;;  %v114_v7 = vld [vmem:[%s405_s3 + $0x58] sm:$0xff]  ;;  %290 = vtanh.f32 %v97_v6  ;;  %v113_v8 = vld [vmem:[%s405_s3 + $0x50] sm:$0xff]  ;;  %vm191_vm2 = vcmask 25600   ;;  %vm201_vm3 = vcmask 24576  }
   0x8   :  { %259 = vmatpush3.msra.mxu0 %v115_v4  ;;  %v112_v9 = vld [vmem:[%s405_s3 + $0x48] sm:$0xff]  ;;  %v111_v10 = vld [vmem:[%s405_s3 + $0x40] sm:$0xff]  ;;  %v110_v11 = vld [vmem:[%s405_s3 + $0x38] sm:$0xff] }
   0x9   :  { %260 = vmatprep.subr.mxu0 %v314_v1  ;;  %v109_v12 = vld [vmem:[%s405_s3 + $0x30] sm:$0xff]  ;;  %v108_v13 = vld [vmem:[%s405_s3 + $0x28] sm:$0xff]  ;;  %v107_v15 = vld [vmem:[%s405_s3 + $0x20] sm:$0xff] }
   0xa   :  { %261 = vmatpush3.msra.mxu0 %v114_v7  ;;  %v106_v17 = vld [vmem:[%s405_s3 + $0x18] sm:$0xff]  ;;  %v95_v18 = vld [vmem:[%s403_s1] sm:$0x3]  ;;  %v105_v20 = vld [vmem:[%s405_s3 + $0x10] sm:$0xff] }
   0xb   :  { %262 = vmatprep.subr.mxu0 %v314_v1  ;;  %v104_v22 = vld [vmem:[%s405_s3 + $0x8] sm:$0xff]  ;;  %v103_v23 = vld [vmem:[%s405_s3] sm:$0xff]  ;;  %s316_s3 = smov [#allocation2]  }
   0xc   :  { %263 = vmatpush3.msra.mxu0 %v113_v8  ;;  %v96_v25 = vld [vmem:[%s404_s2] sm:$0x3]  ;;  %s209_s25 = sshll.u32 %s316_s3, 4  ;;  %s210_s25 = int_to_ptr.vmem [resolvable:$true] %s209_s25 }
   0xd   :  { %264 = vmatprep.subr.mxu0 %v314_v1  ;;  %vm189_vm1 = vcmp.gt.f32.partialorder %v96_v25, 0.5  ;;  %v199_v35 = vld [vmem:[#allocation2] sm:$0x1]  ;;  %s292_s2 = scalar_lea.vmem %s210_s25, 16  ;;  %s296_s26 = scalar_lea.vmem %s210_s25, 32 }
   0xe   :  { %265 = vmatpush3.msra.mxu0 %v112_v9  ;;  %p293_p0 = scmp.ne.s32.totalorder %s210_s25, %s292_s2  ;;  %p297_p1 = scmp.lt.s32.totalorder %s210_s25, %s210_s25 }
   0xf   :  { %266 = vmatprep.subr.mxu0 %v314_v1  ;;  %p298_p2 = scmp.lt.s32.totalorder %s296_s26, %s292_s2 }
  0x10   :  { %267 = vmatpush3.msra.mxu0 %v111_v10 }
  0x11   :  { %268 = vmatprep.subr.mxu0 %v314_v1  ;;  %p299_p3 = por %p298_p2, %p297_p1 }
  0x12   :  { %269 = vmatpush3.msra.mxu0 %v110_v11 }
  0x13   :  { %270 = vmatprep.subr.mxu0 %v314_v1  ;;  %p300_p4 = pnand %p299_p3, %p293_p0 }
  0x14   :  { %271 = vmatpush3.msra.mxu0 %v109_v12  ;;  %v291_v14 = vpop.eup %290 }
  0x15   :  { %272 = vmatprep.subr.mxu0 %v314_v1  ;;  %v99_v16 = vmul.f32 0.5, %v291_v14 }
  0x16   :  { %273 = vmatpush3.msra.mxu0 %v108_v13 }
  0x17   :  { %274 = vmatprep.subr.mxu0 %v314_v1  ;;  %v100_v19 = vadd.f32 0.5, %v99_v16 }
  0x18   :  { %275 = vmatpush3.msra.mxu0 %v107_v15 }
  0x19   :  { %276 = vmatprep.subr.mxu0 %v314_v1  ;;  %v101_v21 = vsub.f32 %v100_v19, %v95_v18 }
  0x1a   :  { %277 = vmatpush3.msra.mxu0 %v106_v17 }
  0x1b   :  { %278 = vmatprep.subr.mxu0 %v314_v1  ;;  %v102_v24 = vand.u32 2147483647, %v101_v21 }
  0x1c   :  { %279 = vmatpush3.msra.mxu0 %v105_v20 }
  0x1d   :  { %280 = vmatprep.subr.mxu0 %v314_v1 }
  0x1e   :  { %281 = vmatpush3.msra.mxu0 %v104_v22 }
  0x1f   :  { %282 = vmatprep.subr.mxu0 %v314_v1 }
  0x20   :  { %283 = vmatpush3.msra.mxu0 %v103_v23 }
  0x21   :  { %285 = vmatmul.mubr.f32.vlgmr.msra.gmra.mxu0 %v102_v24 }
  0xe1   :  { %v185_v26 = vpop.f32.mrf.mxu0 }
  0xe2   :  { %v190_v27 = vsel %vm189_vm1, %v185_v26, 0.0 }
  0xe3   :  { %v192_v28 = vsel %vm191_vm2, %v190_v27, 0.0  ;;  %v286_v29 = vpop.f32.mrf.mxu0 }
  0xe4   :  { %v193_v30 = vrot.slane %v192_v28, 4 }
  0xe6   :  { %v194_v31 = vadd.f32 %v193_v30, %v192_v28 }
  0xe8   :  { %v195_v32 = vrot.slane %v194_v31, 2 }
  0xea   :  { %v196_v33 = vadd.f32 %v195_v32, %v194_v31 }
  0xec   :  { %v197_v34 = vrot.slane %v196_v33, 1 }
  0xee   :  { %v198_v36 = vadd.f32 %v197_v34, %v196_v33 }
  0xf0   :  { %v200_v37 = vadd.f32 %v199_v35, %v198_v36 }
  0xf2   :  { %202 = vst.msk [vmem:[#allocation2] sm:$0x1] %vm201_vm3, %v200_v37 }
  0xf3   :  { %303 = shalt.err (!%p300_p4)
}
  0xf4   :  { %212 = dma.vmem_to_hbm [thread:$0]  %s210_s25, 16, %s406_s4, [#allocation3]  }
  0xf5   :  { %312 = dma.done.wait [#allocation3], 16  }
  0xf6   :  { %313 = vsyncadd [#allocation3], 4294967280 }
  0xf7   :  { %216 = vsyncpa [#allocation3], 1 }

</bundles_post_ra>
